<compile_context>
chip_gen: v6e
topology: v6e:2x2x1
jax: 0.10.0
libtpu: 0.0.40
codegen_flags: <defaults>
</compile_context>

<pallas_src>
import functools

import jax
import jax.numpy as jnp
from jax import lax
from jax.experimental import pallas as pl
from jax.experimental.pallas import tpu as pltpu


# --------------------------------------------------------------------------------------
# Kernel 1: row-tiled linear projection  y = x @ W^T   (W kept in PyTorch (out, in) layout)
# --------------------------------------------------------------------------------------
def _linear_wt_kernel(x_ref, w_ref, o_ref):
    x = x_ref[...].astype(jnp.bfloat16)          # bf16 MXU operands, f32 accumulation
    w = w_ref[...].astype(jnp.bfloat16)
    y = lax.dot_general(x, w, dimension_numbers=(((1,), (1,)), ((), ())),
                        preferred_element_type=jnp.float32)
    o_ref[...] = y.astype(o_ref.dtype)


def linear_wt(x, w, out_dtype=jnp.bfloat16, row_tile=256):
    """x: (M, K), w: (N, K)  ->  (M, N) == x @ w.T  (no wrapper-side weight transpose)."""
    m, k = x.shape
    n = w.shape[0]
    tm = min(row_tile, m)                        # m < row_tile -> full-dim block (always legal)
    return pl.pallas_call(
        _linear_wt_kernel,
        grid=(pl.cdiv(m, tm),),
        in_specs=[pl.BlockSpec((tm, k), lambda i: (i, 0)),
                  pl.BlockSpec((n, k), lambda i: (0, 0))],     # weight block resident
        out_specs=pl.BlockSpec((tm, n), lambda i: (i, 0)),
        out_shape=jax.ShapeDtypeStruct((m, n), out_dtype),
        compiler_params=pltpu.CompilerParams(dimension_semantics=("parallel",)),
    )(x, w)


# --------------------------------------------------------------------------------------
# Kernel 2: fused relative multi-head attention (one batch element per grid step)
# --------------------------------------------------------------------------------------
def _rel_shift_rows(x):
    """Exact replica of RelMultiHeadAttn._rel_shift on a single (Q, K) score matrix (Q == K),
    built from static slices/concats so it never leaves VMEM.

    Row i of the result is the flat window:  [ x[i, K-1-i:K], 0, x[i+1, 0:K-i-2] ]
    (the last row is unchanged).
    TODO(synk): for long sequences replace the unrolled row windows with a single
    pltpu.roll(..., stride=1, stride_axis=0) per-sublane strided lane rotation + masks.
    """
    q, k = x.shape
    rows = []
    for i in range(q - 1):
        pieces = [x[i:i + 1, k - 1 - i:k], jnp.zeros((1, 1), x.dtype)]
        if k - i - 2 > 0:
            pieces.append(x[i + 1:i + 2, 0:k - i - 2])
        rows.append(jnp.concatenate(pieces, axis=1))
    rows.append(x[q - 1:q, :])
    return jnp.concatenate(rows, axis=0)


def _fused_attn_kernel(qkv_ref, rk_ref, o_ref, *, n_head, d_head, scale):
    # qkv_ref : (1, Q, 3*H*Dh) bf16  (q | k | v concatenated on the lane axis)
    # rk_ref  : (R, H*Dh)      bf16  (relative keys, resident across the whole grid)
    # o_ref   : (1, Q, H*Dh)         attention output for this batch element
    hd = n_head * d_head
    dn = (((1,), (1,)), ((), ()))                # contract over d_head
    out_heads = []
    for h in range(n_head):
        lo, hi = h * d_head, (h + 1) * d_head
        q_h = qkv_ref[0, :, lo:hi]               # (Q, Dh) bf16
        k_h = qkv_ref[0, :, hd + lo:hd + hi]     # (K, Dh) bf16  (klen == qlen, no mems)
        v_h = qkv_ref[0, :, 2 * hd + lo:2 * hd + hi]
        rk_h = rk_ref[:, lo:hi]                  # (R, Dh) bf16

        ac = lax.dot_general(q_h, k_h, dn, preferred_element_type=jnp.float32)   # (Q, K)
        bd = lax.dot_general(q_h, rk_h, dn, preferred_element_type=jnp.float32)  # (Q, R)
        bd = _rel_shift_rows(bd)                 # exact _rel_shift, in VMEM

        s = (ac + bd) * scale
        s = s - jnp.max(s, axis=-1, keepdims=True)
        p = jnp.exp(s)
        p = p * pl.reciprocal(jnp.sum(p, axis=-1, keepdims=True), approx=True)
        av = jnp.dot(p.astype(v_h.dtype), v_h, preferred_element_type=jnp.float32)  # (Q, Dh)
        out_heads.append(av)
    o_ref[0, :, :] = jnp.concatenate(out_heads, axis=-1).astype(o_ref.dtype)


# --------------------------------------------------------------------------------------
# Kernel 3: fused o_net projection + residual + LayerNorm (post-norm, pre_lnorm=False)
# --------------------------------------------------------------------------------------
def _out_ln_kernel(av_ref, wo_ref, res_ref, g_ref, b_ref, o_ref, *, eps):
    av = av_ref[...]                                          # (tm, H*Dh) bf16
    wo = wo_ref[...].astype(av.dtype)                         # (D, H*Dh)  PyTorch layout
    proj = lax.dot_general(av, wo, dimension_numbers=(((1,), (1,)), ((), ())),
                           preferred_element_type=jnp.float32)  # (tm, D) = av @ Wo^T
    y = res_ref[...] + proj                                   # residual stays f32
    mean = jnp.mean(y, axis=-1, keepdims=True)
    var = jnp.mean(jnp.square(y - mean), axis=-1, keepdims=True)
    yn = (y - mean) * lax.rsqrt(var + eps)
    o_ref[...] = (yn * g_ref[...] + b_ref[...]).astype(o_ref.dtype)


# --------------------------------------------------------------------------------------
# Wrapper
# --------------------------------------------------------------------------------------
def rel_multihead_attn(w, r, params, *, n_head, d_head):
    qlen, bsz, d_model = w.shape
    rlen = r.shape[0]
    hd = n_head * d_head
    scale = 1.0 / d_head ** 0.5
    assert rlen == qlen  # TODO(synk): mems / ext_len (klen > qlen) path not implemented.

    w_qkv = params["w_qkv"]                      # (3*H*Dh, d_model)  PyTorch (out, in)
    w_o = params["w_o"]                          # (d_model, H*Dh)
    gamma = params["gamma"].reshape(1, d_model)
    beta = params["beta"].reshape(1, d_model)

    # TODO(synk): dropout (self.drop) is identity (eval / p=0); pre_lnorm=True branch and
    # attn_mask handling are omitted; base class defines no r_net / r_w_bias / r_r_bias,
    # so relative keys reuse the K slice of qkv_net (matches the pure-JAX reference below).

    # Batch-major compute layout: one tiny boundary transpose in, one out; every intermediate
    # in between stays in (B*Q, ...) rows, so nothing big is transposed through HBM.
    wb2d = jnp.transpose(w, (1, 0, 2)).reshape(bsz * qlen, d_model)        # (B*Q, D) f32

    # ---- qkv_net: one projection; q/k/v are sliced in-kernel (no jnp.split copies) ----
    qkv = linear_wt(wb2d, w_qkv).reshape(bsz, qlen, 3 * hd)                # bf16

    # ---- relative keys ----
    rk = linear_wt(r, w_qkv[hd:2 * hd])                                    # (R, H*Dh) bf16

    # ---- fused scores + rel_shift + softmax + P@V (scores never touch HBM) ----
    # TODO(synk): for long sequences add klen tiling with an online softmax (flash-style);
    # at these sizes the full (Q, K) rows fit comfortably in VMEM per grid step.
    attn_vec = pl.pallas_call(
        functools.partial(_fused_attn_kernel, n_head=n_head, d_head=d_head, scale=scale),
        grid=(bsz,),
        in_specs=[pl.BlockSpec((1, qlen, 3 * hd), lambda b: (b, 0, 0)),
                  pl.BlockSpec((rlen, hd), lambda b: (0, 0))],   # constant index -> fetched once
        out_specs=pl.BlockSpec((1, qlen, hd), lambda b: (b, 0, 0)),
        out_shape=jax.ShapeDtypeStruct((bsz, qlen, hd), jnp.bfloat16),
        compiler_params=pltpu.CompilerParams(dimension_semantics=("parallel",)),
    )(qkv, rk)

    # ---- o_net + residual + LayerNorm, row-tiled over B*Q ----
    m = bsz * qlen
    tm = min(256, m)
    out2d = pl.pallas_call(
        functools.partial(_out_ln_kernel, eps=1e-5),
        grid=(pl.cdiv(m, tm),),
        in_specs=[pl.BlockSpec((tm, hd), lambda i: (i, 0)),
                  pl.BlockSpec((d_model, hd), lambda i: (0, 0)),
                  pl.BlockSpec((tm, d_model), lambda i: (i, 0)),
                  pl.BlockSpec((1, d_model), lambda i: (0, 0)),
                  pl.BlockSpec((1, d_model), lambda i: (0, 0))],
        out_specs=pl.BlockSpec((tm, d_model), lambda i: (i, 0)),
        out_shape=jax.ShapeDtypeStruct((m, d_model), jnp.float32),
        compiler_params=pltpu.CompilerParams(dimension_semantics=("parallel",)),
    )(attn_vec.reshape(m, hd), w_o, wb2d, gamma, beta)

    return out2d.reshape(bsz, qlen, d_model).transpose(1, 0, 2)            # (Q, B, D)


# --------------------------------------------------------------------------------------
# Pure-JAX f32 reference (mirrors the PyTorch tensor layout, incl. _rel_shift on (q,k,b,n))
# --------------------------------------------------------------------------------------
def reference(w, r, params, *, n_head, d_head):
    qlen, bsz, d_model = w.shape
    scale = 1.0 / d_head ** 0.5
    w_qkv, w_o = params["w_qkv"], params["w_o"]
    qkv = jnp.einsum("qbd,ed->qbe", w, w_qkv)
    q, k, v = jnp.split(qkv, 3, axis=-1)
    q = q.reshape(qlen, bsz, n_head, d_head)
    k = k.reshape(qlen, bsz, n_head, d_head)
    v = v.reshape(qlen, bsz, n_head, d_head)
    w_k_slice = w_qkv[n_head * d_head: 2 * n_head * d_head, :]
    r_k = (r @ w_k_slice.T).reshape(-1, n_head, d_head)
    AC = jnp.einsum("ibnd,jbnd->ijbn", q, k)
    BD = jnp.einsum("ibnd,jnd->ijbn", q, r_k)
    Q, K, B, N = BD.shape
    zp = jnp.zeros((Q, 1, B, N), BD.dtype)
    xp = jnp.concatenate([zp, BD], axis=1).reshape(K + 1, Q, B, N)
    BD = xp[1:].reshape(Q, K, B, N)
    score = (AC + BD) * scale
    prob = jax.nn.softmax(score, axis=1)
    attn_vec = jnp.einsum("ijbn,jbnd->ibnd", prob, v).reshape(qlen, bsz, n_head * d_head)
    y = w + attn_vec @ w_o.T
    mean = y.mean(-1, keepdims=True)
    var = ((y - mean) ** 2).mean(-1, keepdims=True)
    return (y - mean) / jnp.sqrt(var + 1e-5) * params["gamma"] + params["beta"]


if __name__ == "__main__":
    n_head, d_head, d_model = 4, 8, 32
    qlen, bsz = 8, 2
    rlen = qlen

    key = jax.random.PRNGKey(0)
    kw, kr, k1, k2 = jax.random.split(key, 4)
    w = jax.random.normal(kw, (qlen, bsz, d_model), jnp.float32)
    r = jax.random.normal(kr, (rlen, d_model), jnp.float32)
    params = dict(
        w_qkv=0.02 * jax.random.normal(k1, (3 * n_head * d_head, d_model), jnp.float32),
        w_o=0.02 * jax.random.normal(k2, (d_model, n_head * d_head), jnp.float32),
        gamma=jnp.ones((d_model,), jnp.float32),   # nn.LayerNorm default init
        beta=jnp.zeros((d_model,), jnp.float32),
    )

    out = rel_multihead_attn(w, r, params, n_head=n_head, d_head=d_head)
    out = jax.block_until_ready(out)

    ref = reference(w, r, params, n_head=n_head, d_head=d_head)
    assert out.shape == (qlen, bsz, d_model)
    # Kernels use bf16 MXU operands (f32 accumulation) per TPU perf guidance, so compare
    # against the f32 reference with a correspondingly relaxed tolerance (observed ~1e-4).
    assert jnp.allclose(out, ref, atol=1e-2, rtol=1e-2), \
        float(jnp.max(jnp.abs(out - ref)))
    print("KERNEL_OK")
</pallas_src>

<mosaic_0001>
module attributes {stable_mosaic.version = 11 : i64} {
  func.func @_linear_wt_kernel(%arg0: i32, %arg1: memref<16x32xf32, #tpu.memory_space<vmem>>, %arg2: memref<96x32xf32, #tpu.memory_space<vmem>>, %arg3: memref<16x96xbf16, #tpu.memory_space<vmem>>) attributes {dimension_semantics = [#tpu.dimension_semantics<parallel>], iteration_bounds = array<i64: 1>, scalar_prefetch = 0 : i64, scratch_operands = 0 : i64, tpu.core_type = #tpu.core_type<tc>, window_params = [{transform_indices = @transform_0, window_bounds = array<i64: 16, 32>}, {pipeline_mode = #tpu.pipeline_mode<synchronous>, transform_indices = @transform_1, window_bounds = array<i64: 96, 32>}, {transform_indices = @transform_2, window_bounds = array<i64: 16, 96>}]} {
    %c0 = arith.constant 0 : index
    %c0_0 = arith.constant 0 : index
    %0 = vector.load %arg1[%c0, %c0_0] : memref<16x32xf32, #tpu.memory_space<vmem>>, vector<16x32xf32>
    %1 = arith.truncf %0 : vector<16x32xf32> to vector<16x32xbf16>
    %c0_1 = arith.constant 0 : index
    %c0_2 = arith.constant 0 : index
    %2 = vector.load %arg2[%c0_1, %c0_2] : memref<96x32xf32, #tpu.memory_space<vmem>>, vector<96x32xf32>
    %3 = arith.truncf %2 : vector<96x32xf32> to vector<96x32xbf16>
    %cst = arith.constant dense<0.000000e+00> : vector<16x96xf32>
    %4 = tpu.matmul %1, %3, %cst {dimension_numbers = #tpu.dot_dimension_numbers<[1], [1], [0], [0], [0, 0, 1, 0], [], []>} : vector<16x32xbf16>, vector<96x32xbf16>, vector<16x96xf32> -> vector<16x96xf32>
    %5 = arith.truncf %4 : vector<16x96xf32> to vector<16x96xbf16>
    %c0_3 = arith.constant 0 : index
    %c0_4 = arith.constant 0 : index
    %6 = vector.load %arg3[%c0_3, %c0_4] : memref<16x96xbf16, #tpu.memory_space<vmem>>, vector<16x96xbf16>
    tpu.vector_store %arg3[%c0_3, %c0_4], %5 {strides = array<i32>} : memref<16x96xbf16, #tpu.memory_space<vmem>>, vector<16x96xbf16>,
    return
  }
  func.func @transform_0(%arg0: i32) -> (i32, i32) {
    %c0_i32 = arith.constant 0 : i32
    %c0_i32_0 = arith.constant 0 : i32
    return %arg0, %c0_i32 : i32, i32
  }
  func.func @transform_1(%arg0: i32) -> (i32, i32) {
    %c0_i32 = arith.constant 0 : i32
    %c0_i32_0 = arith.constant 0 : i32
    %c0_i32_1 = arith.constant 0 : i32
    return %c0_i32, %c0_i32_0 : i32, i32
  }
  func.func @transform_2(%arg0: i32) -> (i32, i32) {
    %c0_i32 = arith.constant 0 : i32
    %c0_i32_0 = arith.constant 0 : i32
    return %arg0, %c0_i32 : i32, i32
  }
}

</mosaic_0001>

<bundles_post_ra>
// kernel: tpu_custom_call.1
= control target key start
LH: loop header
LB: loop body
LE: loop exit
PB: predicated region body
PF: predicated region fallthrough
CT: control target
= control target key end

     0   :  { %vm34_vm0 = vcmask 261120   ;;  %v179_v2 = vmov 0.0   ;;  %vm180_vm1 = vmmov 0   ;;  %s251_s0 = inlined_call_operand.vmem [shape: f32[16,32], index: 0, kind: input, shape index: {}]   ;;  %s252_s1 = inlined_call_operand.vmem [shape: f32[96,32], index: 1, kind: input, shape index: {}]   ;;  %s253_s2 = inlined_call_operand.hbm [shape: bf16[16,96], index: 2, kind: output, shape index: {}]  }
   0x1   :  { %v26_v0 = vld [vmem:[%s252_s1 + $0x50] sm:$0xff]  ;;  %v27_v1 = vld [vmem:[%s252_s1 + $0x58] sm:$0xff]  ;;  %136 = vmatprep.subr.bf16.mxu0 %v179_v2  ;;  %148 = vmatprep.mubr.msk.bf16.mxu0 %vm180_vm1, %v179_v2  ;;  %v24_v4 = vld [vmem:[%s252_s1 + $0x40] sm:$0xff] }
   0x2   :  { %v33_v3 = vpack.c.bf16 %v27_v1, %v26_v0  ;;  %v25_v5 = vld [vmem:[%s252_s1 + $0x48] sm:$0xff] }
   0x4   :  { %v54_v6 = vsel %vm34_vm0, %v33_v3, 0 }
   0x5   :  { %137 = vmatpush3.bf16.xpose.msra.mxu0 %v54_v6 }
   0x6   :  { %7 = vsyncpa [#allocation3], 0  ;;  %138 = vmatprep.subr.bf16.mxu0 %v179_v2  ;;  %v32_v7 = vpack.c.bf16 %v25_v5, %v24_v4  ;;  %v22_v9 = vld [vmem:[%s252_s1 + $0x30] sm:$0xff]  ;;  %v23_v10 = vld [vmem:[%s252_s1 + $0x38] sm:$0xff]  ;;  %vm105_vm2 = vcmask 781312  }
   0x7   :  { %v31_v11 = vpack.c.bf16 %v23_v10, %v22_v9  ;;  %v20_v13 = vld [vmem:[%s252_s1 + $0x20] sm:$0xff]  ;;  %v21_v14 = vld [vmem:[%s252_s1 + $0x28] sm:$0xff]  ;;  %v18_v17 = vld [vmem:[%s252_s1 + $0x10] sm:$0xff] }
   0x8   :  { %v51_v8 = vsel %vm34_vm0, %v32_v7, 0  ;;  %v30_v15 = vpack.c.bf16 %v21_v14, %v20_v13  ;;  %v19_v18 = vld [vmem:[%s252_s1 + $0x18] sm:$0xff]  ;;  %v16_v21 = vld [vmem:[%s252_s1] sm:$0xff]  ;;  %v17_v22 = vld [vmem:[%s252_s1 + $0x8] sm:$0xff]  ;;  %s181_s1 = smov [#allocation2]  }
   0x9   :  { %v48_v12 = vsel %vm34_vm0, %v31_v11, 0  ;;  %v29_v19 = vpack.c.bf16 %v19_v18, %v18_v17  ;;  %v28_v23 = vpack.c.bf16 %v17_v22, %v16_v21  ;;  %v13_v25 = vld [vmem:[%s251_s0] sm:$0xff]  ;;  %v14_v26 = vld [vmem:[%s251_s0 + $0x8] sm:$0xff]  ;;  %s113_s9 = sshll.u32 %s181_s1, 4  ;;  %s114_s9 = int_to_ptr.vmem [resolvable:$true] %s113_s9 }
   0xa   :  { %v45_v16 = vsel %vm34_vm0, %v30_v15, 0  ;;  %v15_v27 = vpack.c.bf16 %v14_v26, %v13_v25  ;;  %s157_s10 = scalar_lea.vmem %s114_s9, 128  ;;  %p162_p1 = scmp.lt.s32.totalorder %s114_s9, %s114_s9 }
   0xb   :  { %v42_v20 = vsel %vm34_vm0, %v29_v19, 0  ;;  %v39_v24 = vsel %vm34_vm0, %v28_v23, 0  ;;  %p158_p0 = scmp.ne.s32.totalorder %s114_s9, %s157_s10  ;;  %p163_p2 = scmp.lt.s32.totalorder %s157_s10, %s157_s10 }
   0xd   :  { %139 = vmatpush3.bf16.xpose.msra.mxu0 %v51_v8  ;;  %p164_p3 = por %p163_p2, %p162_p1 }
   0xe   :  { %140 = vmatprep.subr.bf16.mxu0 %v179_v2 }
   0xf   :  { %p165_p4 = pnand %p164_p3, %p158_p0 }
  0x15   :  { %141 = vmatpush3.bf16.xpose.msra.mxu0 %v48_v12 }
  0x16   :  { %142 = vmatprep.subr.bf16.mxu0 %v179_v2 }
  0x1d   :  { %143 = vmatpush3.bf16.xpose.msra.mxu0 %v45_v16 }
  0x1e   :  { %144 = vmatprep.subr.bf16.mxu0 %v179_v2 }
  0x25   :  { %145 = vmatpush3.bf16.xpose.msra.mxu0 %v42_v20 }
  0x26   :  { %146 = vmatprep.subr.bf16.mxu0 %v179_v2 }
  0x2d   :  { %147 = vmatpush3.bf16.xpose.msra.mxu0 %v39_v24 }
  0x34   :  { %149 = vmatmul.mubr.msk.bf16.vlgmr.msra.gmra.mxu0 %vm34_vm0, %v15_v27 }
  0xf4   :  { %v90_v28 = vpop.f32.mrf.mxu0 }
  0xf5   :  { %v127_v29 = vpack.c.bf16 %v90_v28, %v90_v28 }
  0xf6   :  { %v150_v30 = vpop.f32.mrf.mxu0 }
  0xf7   :  { %106 = vst.msk [vmem:[#allocation2] sm:$0xf] %vm105_vm2, %v127_v29 }
  0xf8   :  { %v93_v31 = vpop.f32.mrf.mxu0 }
  0xf9   :  { %v128_v32 = vpack.c.bf16 %v93_v31, %v93_v31 }
  0xfa   :  { %v151_v33 = vpop.f32.mrf.mxu0 }
  0xfb   :  { %107 = vst.msk [vmem:[#allocation2 + $0x4] sm:$0xf] %vm105_vm2, %v128_v32 }
  0xfc   :  { %168 = shalt.err (!%p165_p4)
}
  0xfd   :  { %s182_s0 = smov 64   ;;  %s183_s11 = smov 4  }
  0xfe   :  { %119 = dma.vmem_to_hbm [thread:$0]  %s114_s9, 128, %s253_s2, [#allocation3], %s182_s0, %s182_s0, %s183_s11  }
  0xff   :  { %177 = dma.done.wait [#allocation3], 128  }
 0x100   :  { %178 = vsyncadd [#allocation3], 4294967168 }
 0x101   :  { %123 = vsyncpa [#allocation3], 1 }

</bundles_post_ra>
